<compile_context>
chip_gen: v5e
topology: v5e:2x2
jax: 0.10.0
libtpu: 0.0.40
codegen_flags: <defaults>
</compile_context>

<pallas_src>
import functools
import math

import jax
import jax.numpy as jnp
from jax.experimental import pallas as pl
from jax.experimental.pallas import tpu as pltpu


def _round_up(x, m):
    return ((x + m - 1) // m) * m


def _physical_vmem_bytes():
    """Per-core physical VMEM, with a conservative (v7x) fallback."""
    try:
        info = pltpu.get_tpu_info()
        cap = getattr(info, "vmem_capacity_bytes", None)
        if cap:
            return int(cap)
    except Exception:
        pass
    return 64 * 1024 * 1024  # v7x per-TensorCore VMEM (smallest of the three gens)


def _ctc_head_kernel(x_ref, w_ref, b_ref, o_ref, *, approx_reciprocal):
    # Fused linear + bias + softmax over the class dimension.
    x = x_ref[...]
    if x.dtype != w_ref.dtype:
        # In-kernel cast (VPU op, hidden under the output-store DMA bottleneck);
        # avoids a separate wrapper-side astype pass over x in HBM.
        x = x.astype(w_ref.dtype)
    logits = jnp.dot(x, w_ref[...], preferred_element_type=jnp.float32)
    logits = logits + b_ref[...]                      # (tm, C_out) + (1, C_out)
    m = jnp.max(logits, axis=-1, keepdims=True)
    e = jnp.exp(logits - m)
    denom = jnp.sum(e, axis=-1, keepdims=True)
    # NOTE: for the last partial row tile (M % tm != 0) the out-of-bounds rows contain
    # unspecified data and may produce inf/NaN here; softmax is strictly row-wise and
    # the output-block writeback is clipped, so valid rows are unaffected. Do not "fix"
    # this with masking -- it would only add VPU work on the non-binding unit.
    o_ref[...] = (e * pl.reciprocal(denom, approx=approx_reciprocal)).astype(o_ref.dtype)


def prepare_ctc_head_params(weight, bias, *, weight_dtype=None):
    """One-time parameter prep (hoist out of the hot path).

    weight: (C_out, C_in) in PyTorch nn.Linear layout, bias: (C_out,).
    Returns (w_t: (C_in, C_out), b_row: (1, C_out) f32).  No class-dim padding:
    the kernel uses full-extent blocks along C_out, so no post-kernel slice is needed.
    """
    if weight_dtype is None:
        weight_dtype = weight.dtype
    w_t = jnp.asarray(weight.T, dtype=weight_dtype)        # no per-call transpose
    b_row = jnp.asarray(bias, dtype=jnp.float32).reshape(1, -1)   # keep bias f32
    return w_t, b_row


def ctc_head_forward(x, w_t, b_row, *, out_dtype=None, tm=512, approx_reciprocal=False):
    """x: (B, T, C_in) -> softmax(x @ W^T + b) of shape (B, T, C_out) in out_dtype."""
    B, T, C_in = x.shape
    C_in_w, C_out = w_t.shape
    assert C_in_w == C_in
    M = B * T
    if out_dtype is None:
        out_dtype = x.dtype

    x2 = x.reshape(M, C_in)  # free reshape; NO dtype cast here (cast happens in-kernel)

    x_item = jnp.dtype(x.dtype).itemsize
    w_item = jnp.dtype(w_t.dtype).itemsize
    o_item = jnp.dtype(out_dtype).itemsize

    # Row tile alignment: 16 when any bf16 tile participates (sublane packing keeps
    # the saturated store path on unmasked vst), else 8.
    row_align = 16 if min(x_item, w_item, o_item) < 4 else 8

    # Generation-aware VMEM budget: ~70% of physical for the tiling decision, and cap
    # vmem_limit_bytes at ~75% of physical (never the whole VMEM -- leave headroom for
    # Mosaic internal scratch / semaphores, esp. on 64-MiB v7x).
    phys_vmem = _physical_vmem_bytes()
    vmem_budget = int(phys_vmem * 0.70)
    vmem_cap = int(phys_vmem * 0.75)

    # Tile clamps:
    #  * no bigger than the (row-aligned) problem,
    #  * small enough that the 1-D grid has >= 2 steps so dimension_semantics=
    #    ("parallel",) can shard rows across both v7x TensorCores.
    tm = min(tm, _round_up(M, row_align))
    tm = min(tm, max(row_align, _round_up(-(-M // 2), row_align)))
    tm = max(row_align, _round_up(tm, row_align))

    def vmem_estimate(tm_):
        w_bytes = 2 * C_in * C_out * w_item            # resident weight (spec double-buffer)
        b_bytes = 2 * C_out * 4
        x_tiles = 2 * tm_ * C_in * x_item              # double-buffered input tiles
        x_cast = (tm_ * C_in * w_item) if w_item != x_item else 0
        o_tiles = 2 * tm_ * C_out * o_item             # double-buffered output tiles
        temps = 3 * tm_ * C_out * 4                    # logits / exp / pre-cast result (f32)
        return w_bytes + b_bytes + x_tiles + x_cast + o_tiles + temps

    while tm > 256 and vmem_estimate(tm) > vmem_budget:
        tm //= 2
    tm = max(row_align, _round_up(tm, row_align))
    # TODO(synk): for vocabularies so large that even tm<=256 plus the resident weight
    #             overflow the budget, tile C_out on a second ("arbitrary") grid axis
    #             with an online-softmax accumulator (pl.when init/finalize).

    vmem_limit = int(min(max(int(1.25 * vmem_estimate(tm)), 32 * 1024 * 1024), vmem_cap))

    cost = pl.CostEstimate(
        flops=2 * M * C_in * C_out,
        transcendentals=M * C_out,
        bytes_accessed=(M * C_in * x_item + C_in * C_out * w_item
                        + C_out * 4 + M * C_out * o_item),
    )

    kernel = functools.partial(_ctc_head_kernel, approx_reciprocal=approx_reciprocal)

    out = pl.pallas_call(
        kernel,
        out_shape=jax.ShapeDtypeStruct((M, C_out), out_dtype),
        grid_spec=pltpu.PrefetchScalarGridSpec(
            num_scalar_prefetch=0,
            grid=(pl.cdiv(M, tm),),                              # no host-side padding of x
            in_specs=[
                pl.BlockSpec((tm, C_in), lambda i: (i, 0)),
                pl.BlockSpec((C_in, C_out), lambda i: (0, 0)),   # resident transposed weight
                pl.BlockSpec((1, C_out), lambda i: (0, 0)),      # resident bias row
            ],
            out_specs=pl.BlockSpec((tm, C_out), lambda i: (i, 0)),
        ),
        compiler_params=pltpu.CompilerParams(
            dimension_semantics=("parallel",),
            vmem_limit_bytes=vmem_limit,
        ),
        cost_estimate=cost,
    )(x2, w_t, b_row)

    # Free reshape only -- no column slice, no extra HBM pass.
    return out.reshape(B, T, C_out)
    # TODO(synk): if the downstream consumer is greedy CTC decode, fuse argmax/max-prob
    #             into the kernel epilogue and emit (tm, 1) blocks instead of the full
    #             probability matrix (removes essentially all output HBM traffic).


if __name__ == "__main__":
    # small shapes consistent with the module's forward: (batch, seq, in_channels)
    B, T = 2, 8
    in_channels, out_channels = 32, 64

    key = jax.random.PRNGKey(0)
    kx, kw, kb = jax.random.split(key, 3)

    # deterministic "paddle-style" uniform init (same as apply_paddle_init=True)
    stdv = 1.0 / math.sqrt(in_channels * 1.0)
    weight = jax.random.uniform(kw, (out_channels, in_channels),
                                minval=-stdv, maxval=stdv, dtype=jnp.float32)
    bias = jax.random.uniform(kb, (out_channels,),
                              minval=-stdv, maxval=stdv, dtype=jnp.float32)
    x = jax.random.normal(kx, (B, T, in_channels), dtype=jnp.float32)

    # pure-JAX reference (eval path of the module)
    ref = jax.nn.softmax(x @ weight.T + bias, axis=2)

    # f32 path, exact reciprocal (safe if the probabilities feed CTC loss / beam search)
    w_t, b_row = prepare_ctc_head_params(weight, bias)
    out = jax.block_until_ready(ctc_head_forward(x, w_t, b_row))
    assert out.shape == (B, T, out_channels)
    assert jnp.allclose(out, ref, atol=2e-3, rtol=2e-3)
    assert jnp.allclose(jnp.sum(out, axis=-1), 1.0, atol=1e-3)

    # fast path: bf16 weights (in-kernel x cast, f32 MXU accumulation), bf16 output
    # probabilities, approximate EUP reciprocal -- halves the dominant store bytes.
    w_bf16, b_row2 = prepare_ctc_head_params(weight, bias, weight_dtype=jnp.bfloat16)
    out_fast = jax.block_until_ready(
        ctc_head_forward(x, w_bf16, b_row2, out_dtype=jnp.bfloat16,
                         approx_reciprocal=True))
    assert out_fast.shape == (B, T, out_channels)
    assert out_fast.dtype == jnp.bfloat16
    assert jnp.allclose(out_fast.astype(jnp.float32), ref, atol=3e-2, rtol=3e-2)

    # TODO(synk): mid_channels != None (fc1+fc2) branch and training-mode raw-logit /
    #             return_feats outputs are not fused here; this implements the eval
    #             path (linear + softmax) of the default mid_channels=None config.

    print("KERNEL_OK")
</pallas_src>

<mosaic_0001>
module attributes {stable_mosaic.version = 11 : i64} {
  func.func @_ctc_head_kernel(%arg0: i32, %arg1: memref<8x32xf32, #tpu.memory_space<vmem>>, %arg2: memref<32x64xf32, #tpu.memory_space<vmem>>, %arg3: memref<1x64xf32, #tpu.memory_space<vmem>>, %arg4: memref<8x64xf32, #tpu.memory_space<vmem>>) attributes {dimension_semantics = [#tpu.dimension_semantics<parallel>], iteration_bounds = array<i64: 2>, scalar_prefetch = 0 : i64, scratch_operands = 0 : i64, tpu.core_type = #tpu.core_type<tc>, window_params = [{transform_indices = @transform_0, window_bounds = array<i64: 8, 32>}, {pipeline_mode = #tpu.pipeline_mode<synchronous>, transform_indices = @transform_1, window_bounds = array<i64: 32, 64>}, {pipeline_mode = #tpu.pipeline_mode<synchronous>, transform_indices = @transform_2, window_bounds = array<i64: 1, 64>}, {transform_indices = @transform_3, window_bounds = array<i64: 8, 64>}]} {
    %c0 = arith.constant 0 : index
    %c0_0 = arith.constant 0 : index
    %0 = vector.load %arg1[%c0, %c0_0] : memref<8x32xf32, #tpu.memory_space<vmem>>, vector<8x32xf32>
    %c0_1 = arith.constant 0 : index
    %c0_2 = arith.constant 0 : index
    %1 = vector.load %arg2[%c0_1, %c0_2] : memref<32x64xf32, #tpu.memory_space<vmem>>, vector<32x64xf32>
    %cst = arith.constant dense<0.000000e+00> : vector<8x64xf32>
    %2 = tpu.matmul %0, %1, %cst {dimension_numbers = #tpu.dot_dimension_numbers<[1], [0], [0], [1], [0, 0, 1, 1], [], []>} : vector<8x32xf32>, vector<32x64xf32>, vector<8x64xf32> -> vector<8x64xf32>
    %c0_3 = arith.constant 0 : index
    %c0_4 = arith.constant 0 : index
    %3 = vector.load %arg3[%c0_3, %c0_4] : memref<1x64xf32, #tpu.memory_space<vmem>>, vector<1x64xf32>
    %4 = vector.broadcast %3 : vector<1x64xf32> to vector<8x64xf32>
    %5 = arith.addf %2, %4 : vector<8x64xf32>
    %cst_5 = arith.constant dense<0xFF800000> : vector<8xf32>
    %6 = vector.multi_reduction <maximumf>, %5, %cst_5 [1] : vector<8x64xf32> to vector<8xf32>
    %7 = vector.shape_cast %6 : vector<8xf32> to vector<8x1xf32>
    %8 = vector.broadcast %7 : vector<8x1xf32> to vector<8x64xf32>
    %9 = arith.subf %5, %8 : vector<8x64xf32>
    %10 = math.exp %9 : vector<8x64xf32>
    %cst_6 = arith.constant dense<0.000000e+00> : vector<8xf32>
    %11 = vector.multi_reduction <add>, %10, %cst_6 [1] : vector<8x64xf32> to vector<8xf32>
    %12 = vector.shape_cast %11 : vector<8xf32> to vector<8x1xf32>
    %13 = tpu.reciprocal %12 : vector<8x1xf32> -> vector<8x1xf32>
    %14 = vector.broadcast %13 : vector<8x1xf32> to vector<8x64xf32>
    %15 = arith.mulf %10, %14 : vector<8x64xf32>
    %c0_7 = arith.constant 0 : index
    %c0_8 = arith.constant 0 : index
    %16 = vector.load %arg4[%c0_7, %c0_8] : memref<8x64xf32, #tpu.memory_space<vmem>>, vector<8x64xf32>
    tpu.vector_store %arg4[%c0_7, %c0_8], %15 {strides = array<i32>} : memref<8x64xf32, #tpu.memory_space<vmem>>, vector<8x64xf32>,
    return
  }
  func.func @transform_0(%arg0: i32) -> (i32, i32) {
    %c0_i32 = arith.constant 0 : i32
    %c0_i32_0 = arith.constant 0 : i32
    return %arg0, %c0_i32 : i32, i32
  }
  func.func @transform_1(%arg0: i32) -> (i32, i32) {
    %c0_i32 = arith.constant 0 : i32
    %c0_i32_0 = arith.constant 0 : i32
    %c0_i32_1 = arith.constant 0 : i32
    return %c0_i32, %c0_i32_0 : i32, i32
  }
  func.func @transform_2(%arg0: i32) -> (i32, i32) {
    %c0_i32 = arith.constant 0 : i32
    %c0_i32_0 = arith.constant 0 : i32
    %c0_i32_1 = arith.constant 0 : i32
    return %c0_i32, %c0_i32_0 : i32, i32
  }
  func.func @transform_3(%arg0: i32) -> (i32, i32) {
    %c0_i32 = arith.constant 0 : i32
    %c0_i32_0 = arith.constant 0 : i32
    return %arg0, %c0_i32 : i32, i32
  }
}

</mosaic_0001>

<bundles_post_ra>
// kernel: tpu_custom_call.1
= control target key start
LH: loop header
LB: loop body
LE: loop exit
PB: predicated region body
PF: predicated region fallthrough
CT: control target
= control target key end

     0   :  { %8 = vsyncpa [#allocation3], 0  ;;  %s740_s0 = inlined_call_operand.hbm [shape: f32[16,32], index: 0, kind: input, shape index: {}]   ;;  %s741_s1 = inlined_call_operand.hbm [shape: f32[32,64], index: 1, kind: input, shape index: {}]   ;;  %s742_s2 = inlined_call_operand.vmem [shape: f32[1,64], index: 2, kind: input, shape index: {}]   ;;  %s743_s3 = inlined_call_operand.hbm [shape: f32[16,64], index: 3, kind: output, shape index: {}]  }
   0x1   :  { %10 = vsyncpa [#allocation3 + $0x1], 0 }
   0x2   :  { %11 = vsyncpa [#allocation6], 0 }
   0x3   :  { %12 = vsyncpa [#allocation4], 0 }
   0x4   :  { %14 = vsyncpa [#allocation4 + $0x1], 0  ;;  %s594_s12 = smov 0   ;;  %s596_s13 = smov 0  }
   0x5   :  { %s598_s14 = smov 0   ;;  %s600_s15 = smov 0  }
   0x6 LB: > { %s130_s18 = sshll.u32 %s741_s1, 4  ;;  %s618_s19 = sadd.s32 4294967295, %s569_s15   ;;  %s569_s15 = sphi %s600_s15, %s753_s15   ;;  %s565_s14 = sphi %s598_s14, %s752_s14   ;;  %s561_s13 = sphi %s596_s13, %s751_s13   ;;  %s557_s12 = sphi %s594_s12, %s750_s12   ;;  %s131_s18 = int_to_ptr.hbm [resolvable:$true] %s130_s18 }
   0x7   : > { %p361_p0 = scmp.ge.s32.totalorder %s569_s15, 1  ;;  %p41_p1 = scmp.eq.s32.totalorder %s618_s19, 0 }
   0x8   : > { %p119_p2 = scmp.lt.s32.totalorder %s569_s15, 3  ;;  %s571_s21 = smov [#allocation5]  }
   0x9   : > { %s132_s22 = sshll.u32 %s571_s21, 4  ;;  %s572_s23 = smov 128   ;;  %s133_s22 = int_to_ptr.vmem [resolvable:$true] %s132_s22 }
   0xa   : > { %p623_p3 = pnand %p361_p0, %p119_p2  ;;  %s573_s24 = smov 8  }
   0xb   : > { %s360_s25 = sadd.s32 4294967294, %s569_s15   ;;  %s634_s26 = sadd.s32 1, %s569_s15  }
   0xc   : > { %p383_p4 = pneg %p623_p3  ;;  %s27_s27 = sadd.s32 1, %s565_s14 }
   0xd   : > { %s24_s28 = ssub.s32 %s569_s15, %s634_s26  ;;  %p34_p7 = scmp.ne.s32.totalorder %s565_s14, %s561_s13 }
   0xe   : > { %p384_p6 = pnand %p383_p4, %p41_p1  ;;  %p25_p8 = scmp.eq.s32.totalorder %s24_s28, 0 }
   0xf   : > { %p35_p9 = scmp.eq.s32.totalorder %s569_s15, 0  ;;  %p40_p10 = scmp.ne.s32.totalorder %s561_s13, %s557_s12 }
  0x10   : > { %386 = dma.hbm_to_vmem [thread:$0]  (!%p384_p6), %s131_s18, 512, %s133_s22, [#allocation6], %s572_s23, %s572_s23, %s573_s24  }
  0x11   : > { %p106_p11 = scmp.eq.s32.totalorder %s618_s19, 1  ;;  %p650_p12 = por %p41_p1, %p40_p10 }
  0x12   : > { %s646_s29 = scalar_select %p25_p8, %s565_s14, %s27_s27  }
  0x13   : > { %p654_p13 = por %p106_p11, %p34_p7  ;;  %p112_p0 = scmp.eq.s32.totalorder %s360_s25, 1 }
  0x14   : > { %p36_p2 = por %p35_p9, %p34_p7  ;;  %s149_s5 = sand.u32 1, %s565_s14  }
  0x15   : > { %p659_p4 = por %p112_p0, %p40_p10  ;;  %p396_p6 = scmp.lt.s32.totalorder %s569_s15, 2 }
  0x16   : > { %s364_s7 = sshll.u32 %s149_s5, 3  ;;  %s365_s8 = sshll.u32 %s569_s15, 3 }
  0x17   : > { %s157_s11 = scalar_lea.hbm %s740_s0, %s365_s8  ;;  %s153_s17 = scalar_lea.vmem [#allocation2], %s364_s7 }
  0x18   : > { %s159_s16 = sshll.u32 %s157_s11, 4  ;;  %s161_s18 = sshll.u32 %s153_s17, 4  ;;  %s160_s16 = int_to_ptr.hbm [resolvable:$true] %s159_s16  ;;  %s162_s18 = int_to_ptr.vmem [resolvable:$true] %s161_s18 }
  0x19   : > { %p668_p8 = pnand %p396_p6, %p36_p2  ;;  %s150_s22 = scalar_lea.sflag [#allocation3], %s149_s5 }
  0x1a   : > { %s469_s23 = sshra.s32 %s160_s16, 4  ;;  %s476_s28 = scalar_lea.hbm %s740_s0, 16  ;;  %s470_s23 = int_to_ptr.hbm [resolvable:$true] %s469_s23 }
  0x1b   : > { %s471_s24 = scalar_lea.hbm %s470_s23, 8  ;;  %p473_p9 = pneg %p668_p8 }
  0x1c   : > { %p472_p7 = scmp.ne.s32.totalorder %s470_s23, %s471_s24  ;;  %p477_p0 = scmp.lt.s32.totalorder %s470_s23, %s740_s0 }
  0x1d   : > { %p478_p2 = scmp.lt.s32.totalorder %s476_s28, %s471_s24 }
  0x1e   : > { %p474_p10 = pnand %p473_p9, %p472_p7 }
  0x1f   : > { %p479_p6 = por %p478_p2, %p477_p0 }
  0x20   : > { %p475_p11 = pneg %p474_p10 }
  0x22   : > { %p480_p5 = pnand %p479_p6, %p475_p11 }
  0x24   : > { %483 = shalt.err (!%p480_p5)
}
  0x25   : > { %390 = dma.hbm_to_vmem [thread:$0]  (!%p668_p8), %s160_s16, 128, %s162_s18, %s150_s22  }
  0x26   : > { %170 = sbr.rel (%p623_p3) target bundleno = 449 (0x1c1), region = 32  ;;  %s685_s5 = sand.u32 (!%p623_p3), 1, %s561_s13  }
  0x27   : > { %s367_s9 = sshll.u32 (!%p623_p3), %s685_s5, 3  ;;  %s173_s10 = scalar_lea.sflag (!%p623_p3), [#allocation3], %s685_s5 }
  0x28   : > { %s176_s11 = scalar_lea.vmem (!%p623_p3), [#allocation2], %s367_s9 }
  0x2b   : > { %544 = dma.done.wait (%p650_p12), %s173_s10, 128  }
  0x2c   : > { %546 = vsyncadd (%p650_p12), %s173_s10, 4294967168 }
  0x2d   : > { %548 = dma.done.wait (%p41_p1), [#allocation6], 512  }
  0x2e   : > { %550 = vsyncadd (%p41_p1), [#allocation6], 4294966784  ;;  %v209_v0 = vld [vmem:[#allocation5 + $0x18] sm:$0xff]  ;;  %v208_v1 = vld [vmem:[#allocation5 + $0x10] sm:$0xff]  ;;  %vm214_vm0 = vcmask 261120   ;;  %vm238_vm1 = vcmask 523264  }
  0x2f   : > { %230 = vmatpush.msra.mxu0 %v209_v0  ;;  %v207_v2 = vld [vmem:[#allocation5 + $0x8] sm:$0xff]  ;;  %v206_v3 = vld [vmem:[#allocation5] sm:$0xff]  ;;  %v205_v4 = vld [vmem:[%s176_s11] sm:$0xff]  ;;  %s372_s16 = sshll.u32 %s618_s19, 3  ;;  %s204_s22 = scalar_lea.vmem [#allocation7], %s367_s9 }
  0x30   : > { %v434_v5 = vld [vmem:[%s742_s2] ss:$0 sm:$0xff]  ;;  %s275_s21 = scalar_lea.hbm %s743_s3, %s372_s16  ;;  %s277_s23 = sshll.u32 %s204_s22, 4  ;;  %s278_s23 = int_to_ptr.vmem [resolvable:$true] %s277_s23 }
  0x31   : > { %231 = vmatpush.msra.mxu0 %v208_v1  ;;  %s279_s24 = sshll.u32 %s275_s21, 4  ;;  %s265_s19 = scalar_lea.sflag [#allocation4], %s685_s5  ;;  %s280_s24 = int_to_ptr.hbm [resolvable:$true] %s279_s24 }
  0x32   : > { %s513_s25 = sshra.s32 %s280_s24, 4  ;;  %s519_s8 = scalar_lea.hbm %s743_s3, 16  ;;  %s514_s25 = int_to_ptr.hbm [resolvable:$true] %s513_s25 }
  0x33   : > { %232 = vmatpush.msra.mxu0 %v207_v2  ;;  %s515_s27 = scalar_lea.hbm %s514_s25, 8  ;;  %p520_p12 = scmp.lt.s32.totalorder %s514_s25, %s743_s3 }
  0x34   : > { %p516_p1 = scmp.ne.s32.totalorder %s514_s25, %s515_s27  ;;  %p521_p8 = scmp.lt.s32.totalorder %s519_s8, %s515_s27 }
  0x35   : > { %233 = vmatpush.msra.mxu0 %v206_v3 }
  0x36   : > { %370 = vmatmul.msk.f32.vlgmr.msra.gmra.mxu0 %vm214_vm0, %v205_v4  ;;  %p517_p3 = pnand %p516_p1, %p654_p13  ;;  %p522_p7 = por %p521_p8, %p520_p12 }
  0x38   : > { %p518_p5 = pneg %p517_p3 }
  0x3a   : > { %p523_p9 = pnand %p522_p7, %p518_p5 }
  0xb3   : > { %v235_v6 = vpop.f32.mrf.mxu0 }
  0xb4   : > { %v236_v7 = vadd.f32 %v434_v5, %v235_v6 }
  0xb6   : > { %v239_v8 = vsel %vm238_vm1, %v236_v7, -inf }
  0xb7   : > { %240 = vmax.xlane.f32.xlu0 %v239_v8 }
 0x12a   : > { %v241_v9 = vpop.xlane.xlu0 %240 }
 0x12b   : > { %v242_v10 = vsub.f32 %v236_v7, %v241_v9 }
 0x12d   : > { %v243_v11 = vmul.f32 1.442695, %v242_v10 }
 0x12f   : > { %435 = vpow2.f32 %v243_v11 }
 0x135   : > { %v436_v12 = vpop.eup %435 }
 0x136   : > { %v245_v13 = vsel %vm238_vm1, %v436_v12, 0.0 }
 0x137   : > { %246 = vadd.xlane.f32.xlu0 %v245_v13 }
 0x1aa   : > { %v247_v14 = vpop.xlane.xlu0 %246 }
 0x1ab   : > { %437 = vrcp.f32 %v247_v14  ;;  %v259_v18 = vand.u32 2147483648, %v247_v14  ;;  %v257_v20 = vand.u32 2147483647, %v247_v14  ;;  %vm253_vm3 = vweird.f32 %v247_v14 }
 0x1ad   : > { %v260_v22 = vor.u32 1.1754944e-38, %v259_v18  ;;  %vm258_vm5 = vcmp.eq.f32.partialorder %v257_v20, 8.507059e+37 }
 0x1b1   : > { %v438_v15 = vpop.eup %437 }
 0x1b2   : > { %v249_v16 = vmul.f32 %v438_v15, %v247_v14  ;;  %vm254_vm2 = vweird.f32 %v438_v15 }
 0x1b3   : > { %vm255_vm4 = vmor %vm253_vm3, %vm254_vm2 }
 0x1b4   : > { %v250_v17 = vsub.f32 1.0, %v249_v16 }
 0x1b6   : > { %v251_v19 = vmul.f32 %v438_v15, %v250_v17 }
 0x1b8   : > { %v252_v21 = vadd.f32 %v438_v15, %v251_v19 }
 0x1ba   : > { %v256_v23 = vsel %vm255_vm4, %v438_v15, %v252_v21 }
 0x1bb   : > { %v261_v24 = vsel %vm258_vm5, %v260_v22, %v256_v23 }
 0x1bc   : > { %v262_v25 = vmul.f32 %v436_v12, %v261_v24 }
 0x1be   : > { %263 = vst.msk [vmem:[%s204_s22] sm:$0xff] %vm238_vm1, %v262_v25 }
 0x1bf   : > { %526 = shalt.err (!%p523_p9)
}
 0x1c0   : > { %381 = dma.vmem_to_hbm [thread:$0]  (%p654_p13), %s278_s23, 128, %s280_s24, %s265_s19  }
 0x1c1 PF: > { %s291_s5 = sand.u32 1, %s557_s12   ;;  %p749_p10 = scmp.ge.s32.totalorder %s569_s15, 2 }
 0x1c2   : > { %s292_s11 = scalar_lea.sflag [#allocation4], %s291_s5 }
 0x1c3   : > { %p392_p11 = pnand %p749_p10, %p659_p4 }
 0x1c5   : > { %p393_p0 = pneg %p392_p11 }
 0x1c7   : > { %552 = dma.done.wait (%p393_p0), %s292_s11, 128  }
 0x1c8   : > { %554 = vsyncadd (%p393_p0), %s292_s11, 4294967168  ;;  %p17_p2 = scmp.ge.s32.totalorder %s634_s26, 4   ;;  %s750_s12 = smov %s561_s13 }
 0x1c9   : > { %s751_s13 = smov %s565_s14  ;;  %s752_s14 = smov %s646_s29 }
 0x1ca   : > { %s753_s15 = smov %s634_s26  ;;  %19 = sbr.rel (!%p17_p2) target bundleno = 6 (0x6), region = 81 }
 0x1cf   :  { %298 = vsyncpa [#allocation3], 1 }
 0x1d0   :  { %300 = vsyncpa [#allocation3 + $0x1], 1 }
 0x1d1   :  { %301 = vsyncpa [#allocation6], 1 }
 0x1d2   :  { %302 = vsyncpa [#allocation4], 1 }
 0x1d3   :  { %304 = vsyncpa [#allocation4 + $0x1], 1 }

</bundles_post_ra>
